<compile_context>
chip_gen: v6e
topology: v6e:2x2x1
jax: 0.10.0
libtpu: 0.0.40
codegen_flags: <defaults>
</compile_context>

<pallas_src>
import jax
import jax.numpy as jnp
import numpy as np
from jax import lax
from jax.experimental import pallas as pl
from jax.experimental.pallas import tpu as pltpu


NEG_SLOPE = 0.2       # nn.LeakyReLU(negative_slope=0.2)
LANE = 128            # TPU lane width
MAX_BATCH_TILE = 4096  # keeps double-buffered blocks within v5e's 16 MiB default


def _round_up(x: int, m: int) -> int:
    return ((x + m - 1) // m) * m


def _make_mlp_kernel(n_layers: int, negative_slope: float):
    """Fused bias-free MLP kernel.

    Refs: (a_ref [tb, n_in], w0_ref [h0, n_in], ..., w_last_ref [out, h_{k-1}],
           o_ref [tb, out]).
    Intermediates are feature-major ([feat, tb], batch on lanes) so the
    LeakyReLU VALU ops and MXU N dimension stay lane-dense; the final layer
    contracts h's feature (sublane) dim so the result lands in [tb, out]
    layout and can be stored straight to the [batch, out_units] output.
    """

    def kernel(*refs):
        a_ref = refs[0]
        w_refs = refs[1:1 + n_layers]
        o_ref = refs[1 + n_layers]

        a = a_ref[...].astype(jnp.float32)                     # [tb, n_in]

        if n_layers == 1:
            # Single layer: a [tb, n_in] x W [out, n_in] over last dims -> [tb, out]
            out = lax.dot_general(
                a, w_refs[0][...],
                dimension_numbers=(((1,), (1,)), ((), ())),
                preferred_element_type=jnp.float32)
            o_ref[...] = out.astype(o_ref.dtype)
            return

        # First layer: W0 [h0, n_in] x a [tb, n_in] over last dims -> [h0, tb]
        h = lax.dot_general(
            w_refs[0][...], a,
            dimension_numbers=(((1,), (1,)), ((), ())),
            preferred_element_type=jnp.float32)
        h = jnp.maximum(h, negative_slope * h)                 # exact LeakyReLU(0.2)

        # Hidden layers: W [out_i, in_i] @ h [in_i, tb] -> [out_i, tb]
        for w_ref in w_refs[1:-1]:
            h = jnp.dot(w_ref[...], h, preferred_element_type=jnp.float32)
            h = jnp.maximum(h, negative_slope * h)

        # Last layer (no activation): contract h's sublane dim against W_last's
        # input dim -> [tb, out], matching the output block layout.
        out = lax.dot_general(
            h, w_refs[-1][...],
            dimension_numbers=(((0,), (1,)), ((), ())),
            preferred_element_type=jnp.float32)
        o_ref[...] = out.astype(o_ref.dtype)

    return kernel


def varphi_forward(a: jax.Array, weights) -> jax.Array:
    """VarPhi forward pass.

    a:       [batch, n_action_units]
    weights: list of [out_features, in_features] arrays (PyTorch layout);
             empty list -> Identity.
    Returns  [batch, out_units] in a's dtype.
    """
    # Identity path: no kernel launch, no HBM round-trip.
    if not weights:
        return a

    n_layers = len(weights)
    batch, n_in = a.shape
    out_units = weights[-1].shape[0]

    # Batch tile selection:
    #  - small batch -> single tile equal to the full batch dim (no padding),
    #  - large batch -> big tiles (step-overhead bound kernel) but at least
    #    2 grid steps so both v7x TensorCores get work.
    if batch <= MAX_BATCH_TILE:
        tb = batch
    else:
        tb = min(MAX_BATCH_TILE, _round_up(pl.cdiv(batch, 2), LANE))
    grid = (pl.cdiv(batch, tb),)

    kernel = _make_mlp_kernel(n_layers, NEG_SLOPE)

    # Activations tile over batch; weights use a constant index_map so they
    # stay VMEM-resident across grid iterations.
    in_specs = [pl.BlockSpec((tb, n_in), lambda i: (i, 0))]
    for w in weights:
        in_specs.append(pl.BlockSpec(w.shape, lambda i: (0, 0)))
    out_spec = pl.BlockSpec((tb, out_units), lambda i: (i, 0))

    return pl.pallas_call(
        kernel,
        out_shape=jax.ShapeDtypeStruct((batch, out_units), a.dtype),
        grid=grid,
        in_specs=in_specs,
        out_specs=out_spec,
        compiler_params=pltpu.CompilerParams(
            dimension_semantics=("parallel",)),   # megacore sharding on v7x
    )(a, *weights)


def init_varphi_weights(n_action_units: int, linear_units, seed: int = 1):
    """Deterministic, bias-free weight init mirroring the MLP layer shapes.

    Returns weights in PyTorch [out_features, in_features] layout.
    """
    if linear_units == [0]:
        linear_units = []
    if not linear_units:
        return []
    dims = [n_action_units] + list(linear_units)
    key = jax.random.PRNGKey(seed)
    weights = []
    for i in range(len(dims) - 1):
        key, sub = jax.random.split(key)
        bound = 1.0 / np.sqrt(dims[i])  # kaiming-uniform-ish, deterministic
        w = jax.random.uniform(
            sub, (dims[i + 1], dims[i]), dtype=jnp.float32,
            minval=-bound, maxval=bound)
        weights.append(w)
    return weights


def varphi_reference(a, weights):
    """Pure-JAX reference (weights in [out, in] layout, like PyTorch)."""
    h = a.astype(jnp.float32)
    for i, w in enumerate(weights):
        h = h @ w.T
        if i < len(weights) - 1:
            h = jnp.where(h >= 0, h, NEG_SLOPE * h)
    return h


if __name__ == "__main__":
    # Shapes consistent with the module: n_action_units=4 mixed through an MLP
    # with linear_units=[32, 16].
    n_action_units = 4
    linear_units = [32, 16]

    key = jax.random.PRNGKey(0)
    k_small, k_big = jax.random.split(key)

    weights = init_varphi_weights(n_action_units, linear_units, seed=1)

    # --- MLP path, small batch (single block, tb == batch) ---
    batch = 8
    a = jax.random.normal(k_small, (batch, n_action_units), dtype=jnp.float32)
    out = jax.block_until_ready(varphi_forward(a, weights))
    assert out.shape == (batch, linear_units[-1])
    np.testing.assert_allclose(np.asarray(out),
                               np.asarray(varphi_reference(a, weights)),
                               rtol=1e-5, atol=1e-5)

    # --- MLP path, large batch (multi-tile grid + partial last block) ---
    big_batch = 9000    # -> tb=4096, grid=(3,), last block partial
    a_big = jax.random.normal(k_big, (big_batch, n_action_units),
                              dtype=jnp.float32)
    out_big = jax.block_until_ready(varphi_forward(a_big, weights))
    np.testing.assert_allclose(np.asarray(out_big),
                               np.asarray(varphi_reference(a_big, weights)),
                               rtol=1e-5, atol=1e-5)

    # --- Single-layer MLP (n_layers == 1 code path) ---
    w_single = init_varphi_weights(n_action_units, [16], seed=1)
    out_single = jax.block_until_ready(varphi_forward(a, w_single))
    np.testing.assert_allclose(np.asarray(out_single),
                               np.asarray(varphi_reference(a, w_single)),
                               rtol=1e-5, atol=1e-5)

    # --- Identity path (linear_units == [] / [0]) -> no kernel launch ---
    out_id = jax.block_until_ready(
        varphi_forward(a, init_varphi_weights(n_action_units, [0], seed=1)))
    np.testing.assert_allclose(np.asarray(out_id), np.asarray(a),
                               rtol=0, atol=0)

    print("KERNEL_OK")
</pallas_src>

<mosaic_0001>
module attributes {stable_mosaic.version = 11 : i64} {
  func.func @kernel(%arg0: i32, %arg1: memref<8x4xf32, #tpu.memory_space<vmem>>, %arg2: memref<32x4xf32, #tpu.memory_space<vmem>>, %arg3: memref<16x32xf32, #tpu.memory_space<vmem>>, %arg4: memref<8x16xf32, #tpu.memory_space<vmem>>) attributes {dimension_semantics = [#tpu.dimension_semantics<parallel>], iteration_bounds = array<i64: 1>, scalar_prefetch = 0 : i64, scratch_operands = 0 : i64, tpu.core_type = #tpu.core_type<tc>, window_params = [{transform_indices = @transform_0, window_bounds = array<i64: 8, 4>}, {pipeline_mode = #tpu.pipeline_mode<synchronous>, transform_indices = @transform_1, window_bounds = array<i64: 32, 4>}, {pipeline_mode = #tpu.pipeline_mode<synchronous>, transform_indices = @transform_2, window_bounds = array<i64: 16, 32>}, {transform_indices = @transform_3, window_bounds = array<i64: 8, 16>}]} {
    %c0 = arith.constant 0 : index
    %c0_0 = arith.constant 0 : index
    %0 = vector.load %arg1[%c0, %c0_0] : memref<8x4xf32, #tpu.memory_space<vmem>>, vector<8x4xf32>
    %c0_1 = arith.constant 0 : index
    %c0_2 = arith.constant 0 : index
    %1 = vector.load %arg2[%c0_1, %c0_2] : memref<32x4xf32, #tpu.memory_space<vmem>>, vector<32x4xf32>
    %cst = arith.constant dense<0.000000e+00> : vector<32x8xf32>
    %2 = tpu.matmul %1, %0, %cst {dimension_numbers = #tpu.dot_dimension_numbers<[1], [1], [0], [0], [0, 0, 1, 0], [], []>} : vector<32x4xf32>, vector<8x4xf32>, vector<32x8xf32> -> vector<32x8xf32>
    %cst_3 = arith.constant 2.000000e-01 : f32
    %3 = vector.broadcast %cst_3 : f32 to vector<32x8xf32>
    %4 = arith.mulf %3, %2 : vector<32x8xf32>
    %5 = arith.maximumf %2, %4 : vector<32x8xf32>
    %c0_4 = arith.constant 0 : index
    %c0_5 = arith.constant 0 : index
    %6 = vector.load %arg3[%c0_4, %c0_5] : memref<16x32xf32, #tpu.memory_space<vmem>>, vector<16x32xf32>
    %cst_6 = arith.constant dense<0.000000e+00> : vector<8x16xf32>
    %7 = tpu.matmul %5, %6, %cst_6 {dimension_numbers = #tpu.dot_dimension_numbers<[0], [1], [1], [0], [0, 1, 1, 0], [], []>} : vector<32x8xf32>, vector<16x32xf32>, vector<8x16xf32> -> vector<8x16xf32>
    %c0_7 = arith.constant 0 : index
    %c0_8 = arith.constant 0 : index
    %8 = vector.load %arg4[%c0_7, %c0_8] : memref<8x16xf32, #tpu.memory_space<vmem>>, vector<8x16xf32>
    tpu.vector_store %arg4[%c0_7, %c0_8], %7 {strides = array<i32>} : memref<8x16xf32, #tpu.memory_space<vmem>>, vector<8x16xf32>,
    return
  }
  func.func @transform_0(%arg0: i32) -> (i32, i32) {
    %c0_i32 = arith.constant 0 : i32
    %c0_i32_0 = arith.constant 0 : i32
    return %arg0, %c0_i32 : i32, i32
  }
  func.func @transform_1(%arg0: i32) -> (i32, i32) {
    %c0_i32 = arith.constant 0 : i32
    %c0_i32_0 = arith.constant 0 : i32
    %c0_i32_1 = arith.constant 0 : i32
    return %c0_i32, %c0_i32_0 : i32, i32
  }
  func.func @transform_2(%arg0: i32) -> (i32, i32) {
    %c0_i32 = arith.constant 0 : i32
    %c0_i32_0 = arith.constant 0 : i32
    %c0_i32_1 = arith.constant 0 : i32
    return %c0_i32, %c0_i32_0 : i32, i32
  }
  func.func @transform_3(%arg0: i32) -> (i32, i32) {
    %c0_i32 = arith.constant 0 : i32
    %c0_i32_0 = arith.constant 0 : i32
    return %arg0, %c0_i32 : i32, i32
  }
}

</mosaic_0001>

<bundles_post_ra>
// kernel: tpu_custom_call.1
= control target key start
LH: loop header
LB: loop body
LE: loop exit
PB: predicated region body
PF: predicated region fallthrough
CT: control target
= control target key end

     0   :  { %vm20_vm0 = vcmask 31744   ;;  %s365_s0 = inlined_call_operand.vmem [shape: f32[8,4], index: 0, kind: input, shape index: {}]   ;;  %s366_s1 = inlined_call_operand.vmem [shape: f32[32,4], index: 1, kind: input, shape index: {}]   ;;  %s367_s2 = inlined_call_operand.vmem [shape: f32[16,32], index: 2, kind: input, shape index: {}]   ;;  %s368_s3 = inlined_call_operand.hbm [shape: f32[8,16], index: 3, kind: output, shape index: {}]  }
   0x1   :  { %v15_v0 = vld [vmem:[%s365_s0] sm:$0xff] }
   0x2   :  { %v16_v1 = vld [vmem:[%s366_s1] sm:$0xff]  ;;  %275 = vmatprep.subr.msk.mxu0 %vm20_vm0, %v15_v0 }
   0x3   :  { %277 = vmatprep.mubr.msk.f32.mxu0 %vm20_vm0, %v16_v1 }
   0x4   :  { %8 = vsyncpa [#allocation3], 0  ;;  %276 = vmatpush3.xpose.msk.msra.mxu0 %vm20_vm0, %v15_v0  ;;  %v17_v2 = vld [vmem:[%s366_s1 + $0x8] sm:$0xff]  ;;  %v18_v3 = vld [vmem:[%s366_s1 + $0x10] sm:$0xff]  ;;  %vm163_vm1 = vcmask 261120   ;;  %v315_v6 = vmov 0.0  }
   0x5   :  { %v19_v4 = vld [vmem:[%s366_s1 + $0x18] sm:$0xff]  ;;  %v130_v5 = vld [vmem:[%s367_s2 + $0x8] sm:$0xff]  ;;  %283 = vmatprep.subr.mxu1 %v315_v6  ;;  %vm316_vm2 = vmmov 0   ;;  %v129_v7 = vld [vmem:[%s367_s2] sm:$0xff]  ;;  %s317_s1 = smov [#allocation2]   ;;  %vm243_vm3 = vcmask 130048  }
   0x6   :  { %287 = vmatprep.mubr.msk.f32.mxu1 %vm316_vm2, %v315_v6  ;;  %284 = vmatpush3.xpose.msk.msra.mxu1 %vm163_vm1, %v130_v5  ;;  %s251_s2 = sshll.u32 %s317_s1, 4  ;;  %s252_s2 = int_to_ptr.vmem [resolvable:$true] %s251_s2 }
   0x7   :  { %278 = vmatmul.mubr.msk.f32.vlgmr.msra.gmra.mxu0 %vm20_vm0, %v17_v2  ;;  %285 = vmatprep.subr.mxu1 %v315_v6  ;;  %s293_s25 = scalar_lea.vmem %s252_s2, 128  ;;  %p298_p1 = scmp.lt.s32.totalorder %s252_s2, %s252_s2 }
   0x8   :  { %280 = vmatprep.mubr.msk.f32.mxu0 %vm20_vm0, %v18_v3  ;;  %p294_p0 = scmp.ne.s32.totalorder %s252_s2, %s293_s25  ;;  %p299_p2 = scmp.lt.s32.totalorder %s293_s25, %s293_s25 }
   0xa   :  { %286 = vmatpush3.xpose.msk.msra.mxu1 %vm163_vm1, %v129_v7  ;;  %p300_p3 = por %p299_p2, %p298_p1 }
   0xb   :  { %281 = vmatmul.mubr.msk.f32.gmra.mxu0 %vm20_vm0, %v19_v4 }
   0xc   :  { %p301_p4 = pnand %p300_p3, %p294_p0 }
  0xc7   :  { %v279_v8 = vpop.f32.mrf.mxu0 }
  0xc8   :  { %v122_v12 = vmul.f32 0.2, %v279_v8 }
  0xc9   :  { %v102_v9 = vpop.f32.mrf.mxu0 }
  0xca   :  { %v121_v10 = vmul.f32 0.2, %v102_v9  ;;  %v126_v16 = vmax.f32 %v279_v8, %v122_v12 }
  0xcb   :  { %v282_v11 = vpop.f32.mrf.mxu0 }
  0xcc   :  { %v125_v13 = vmax.f32 %v102_v9, %v121_v10  ;;  %v124_v17 = vmul.f32 0.2, %v282_v11 }
  0xcd   :  { %v112_v14 = vpop.f32.mrf.mxu0 }
  0xce   :  { %131 = vxpose.xlu0.b32.start [1/4] (short) (narrow) %v125_v13, 8  ;;  %v123_v15 = vmul.f32 0.2, %v112_v14  ;;  %v128_v19 = vmax.f32 %v282_v11, %v124_v17 }
  0xd0   :  { %v127_v18 = vmax.f32 %v112_v14, %v123_v15 }
  0xd2   :  { %132 = vxpose.xlu0.b32.cont [2/4] (short) (narrow) %v126_v16, 8 }
  0xd6   :  { %133 = vxpose.xlu0.b32.cont [3/4] (short) (narrow) %v127_v18, 8 }
  0xda   :  { %134 = vxpose.xlu0.b32.end [4/4] (short) (narrow) %v128_v19, 8 }
 0x14a   :  { %v147_v20 = vpop.trf.xlu0 }
 0x14b   :  { %288 = vmatmul.mubr.msk.f32.vlgmr.msra.gmra.mxu1 %vm163_vm1, %v147_v20 }
 0x20b   :  { %v239_v21 = vpop.f32.mrf.mxu1 }
 0x20c   :  { %244 = vst.msk [vmem:[#allocation2] sm:$0xff] %vm243_vm3, %v239_v21 }
 0x20d   :  { %v289_v22 = vpop.f32.mrf.mxu1 }
 0x20e   :  { %304 = shalt.err (!%p301_p4)
}
 0x20f   :  { %254 = dma.vmem_to_hbm [thread:$0]  %s252_s2, 128, %s368_s3, [#allocation3]  }
 0x210   :  { %313 = dma.done.wait [#allocation3], 128  }
 0x211   :  { %314 = vsyncadd [#allocation3], 4294967168 }
 0x212   :  { %258 = vsyncpa [#allocation3], 1 }

</bundles_post_ra>
